<compile_context>
chip_gen: v5e
topology: v5e:2x2
jax: 0.10.0
libtpu: 0.0.40
codegen_flags: <defaults>
</compile_context>

<pallas_src>
import math

import jax
import jax.numpy as jnp
import numpy as np
from jax.experimental import pallas as pl
from jax.experimental.pallas import tpu as pltpu


def _round_up(x: int, m: int) -> int:
    return ((x + m - 1) // m) * m


def _vmem_budget_bytes() -> int:
    """0.8x of per-core VMEM capacity (generation-aware); safe 64 MiB floor fallback."""
    cap = 64 * 1024 * 1024
    try:
        info = pltpu.get_tpu_info()
        cap = int(getattr(info, "vmem_capacity_bytes", cap))
    except Exception:
        pass
    return max(32 * 1024 * 1024, int(0.8 * cap))


def _derive_max_tile_lanes(c_in, c_out, x_bytes, out_bytes, use_noise, budget):
    """Largest lane tile such that double-buffered slabs + f32 accumulator fit the budget."""
    fixed = (2 * x_bytes * c_out * c_in      # per-sample weight block, double-buffered
             + 2 * 4 * c_out                 # bias block, double-buffered
             + (4 << 20))                    # Mosaic internal scratch / semaphore headroom
    per_lane = (2 * x_bytes * c_in           # x slab, double-buffered
                + 2 * out_bytes * c_out      # out slab, double-buffered
                + 4 * c_out                  # f32 dot accumulator (live intermediate)
                + (2 * 4 if use_noise else 0))
    lanes = (budget - fixed) // per_lane
    lanes = max(128, (lanes // 128) * 128)
    return int(min(lanes, 8192))


def _choose_hw_tiling(hw, max_lanes, want_multi_tiles):
    """Return (hw_padded, tile): lane-aligned (x128) tile; hw padded so the tile divides it."""
    hw128 = _round_up(hw, 128)
    cap = max(128, (max_lanes // 128) * 128)
    if want_multi_tiles and hw128 >= 256:
        # N == 1: make sure the HW axis alone gives >= 2 grid blocks (v7x dual-TC split).
        cap = min(cap, _round_up(hw128 // 2, 128))
    if hw128 <= cap:
        return hw128, hw128
    for t in range(cap, 127, -128):
        if hw128 % t == 0:
            return hw128, t
    hw_pad = _round_up(hw, cap)
    return hw_pad, cap


def _make_kernel(negative_slope, clamp, noise_strength_scaled, use_noise):
    """One generic kernel for both orientations: o = epilogue(lhs @ rhs)."""

    def compute(lhs_ref, rhs_ref, bias_ref, noise_ref, o_ref):
        # lhs_ref  : (1, R, K)   rhs_ref: (1, K, T)   ->  acc: (R, T), f32 accumulation
        # bias_ref : 2-D, broadcast-compatible with (R, T)   (gain pre-baked)
        # noise_ref: (1, r, t) broadcast-compatible with (R, T), optional
        acc = jnp.dot(lhs_ref[0], rhs_ref[0], preferred_element_type=jnp.float32)
        if use_noise:
            acc = acc + noise_ref[0].astype(jnp.float32) * noise_strength_scaled
        acc = acc + bias_ref[...]
        acc = jnp.where(acc >= 0.0, acc, negative_slope * acc)        # leaky_relu_0.2
        if clamp is not None:
            acc = jnp.clip(acc, -clamp, clamp)
        o_ref[0] = acc.astype(o_ref.dtype)

    if use_noise:
        return compute

    def kernel_no_noise(lhs_ref, rhs_ref, bias_ref, o_ref):
        return compute(lhs_ref, rhs_ref, bias_ref, None, o_ref)

    return kernel_no_noise


def stylegan2_conv_forward(x, w, params, *, demodulate=True, noise=None,
                           noise_strength=0.0, gain=1.0, conv_clamp=None,
                           activation_gain=math.sqrt(2.0), negative_slope=0.2,
                           matmul_dtype=jnp.bfloat16, out_dtype=None,
                           max_tile_lanes=None):
    """x: (N, C_in, H, W), w: (N, latent_dim) -> (N, C_out, H, W)."""
    N, C_in, H, W = x.shape
    latent_dim = w.shape[1]
    HW = H * W

    conv_w = params["conv_weight"]                 # (C_out, C_in, k, k)
    assert conv_w.shape[2] == 1 and conv_w.shape[3] == 1, \
        "only kernel_size=1 modulated conv is implemented"
    C_out = conv_w.shape[0]
    out_dtype = x.dtype if out_dtype is None else out_dtype

    act_gain_total = float(activation_gain) * float(gain)
    clamp_total = None if conv_clamp is None else float(conv_clamp) * float(gain)
    ns_scaled = float(noise_strength) * act_gain_total
    negative_slope = float(negative_slope)

    # ---- hoisted per-sample preamble (tiny; plain XLA, once per batch) ----
    styles = (w @ params["affine_weight"].T) * (1.0 / math.sqrt(latent_dim)) \
        + params["affine_bias"]                                       # (N, C_in)
    w2d = conv_w.reshape(C_out, C_in).astype(jnp.float32)
    w_mod = w2d[None, :, :] * styles[:, None, :]                      # (N, C_out, C_in)
    if demodulate:
        d = jax.lax.rsqrt(jnp.sum(w_mod * w_mod, axis=-1, keepdims=True) + 1e-8)
        w_mod = w_mod * d
    # Bake activation_gain*gain into the weight / bias / noise strength so the
    # in-kernel epilogue needs no extra full-width multiply.
    w_ready = (w_mod * act_gain_total).astype(matmul_dtype)           # (N, C_out, C_in)
    bias_scaled = (params["bias"].reshape(C_out).astype(jnp.float32) * act_gain_total)

    use_noise = noise is not None
    x_flat = x.reshape(N, C_in, HW)

    kernel = _make_kernel(negative_slope, clamp_total, ns_scaled, use_noise)
    budget = _vmem_budget_bytes()
    x_bytes = jnp.dtype(matmul_dtype).itemsize
    out_bytes = jnp.dtype(out_dtype).itemsize

    # ------- small-spatial path (4x4 / 8x8 layers): lane axis = C_out -------
    if HW < 128 and C_out >= 128:
        x_t = jnp.transpose(x_flat, (0, 2, 1)).astype(matmul_dtype)   # (N, HW, C_in)
        w_t = jnp.transpose(w_ready, (0, 2, 1))                       # (N, C_in, C_out)
        bias_row = bias_scaled.reshape(1, C_out)
        in_specs = [
            pl.BlockSpec((1, HW, C_in), lambda n: (n, 0, 0)),          # lhs = x tile
            pl.BlockSpec((1, C_in, C_out), lambda n: (n, 0, 0)),       # rhs = weight
            pl.BlockSpec((1, C_out), lambda n: (0, 0)),                # bias (resident)
        ]
        args = [x_t, w_t, bias_row]
        if use_noise:
            if noise.ndim == 2:                                        # const (H, W) buffer
                nz = noise.reshape(1, HW, 1).astype(jnp.float32)
                nmap = lambda n: (0, 0, 0)
            else:                                                      # per-sample map
                nz = noise.reshape(N, HW, 1).astype(jnp.float32)
                nmap = lambda n: (n, 0, 0)
            in_specs.append(pl.BlockSpec((1, HW, 1), nmap))
            args.append(nz)
        out_t = pl.pallas_call(
            kernel,
            out_shape=jax.ShapeDtypeStruct((N, HW, C_out), out_dtype),
            grid_spec=pltpu.PrefetchScalarGridSpec(
                num_scalar_prefetch=0,
                grid=(N,),
                in_specs=in_specs,
                out_specs=pl.BlockSpec((1, HW, C_out), lambda n: (n, 0, 0)),
            ),
            compiler_params=pltpu.CompilerParams(
                dimension_semantics=("parallel",),
                vmem_limit_bytes=budget,
            ),
        )(*args)
        return jnp.transpose(out_t, (0, 2, 1)).reshape(N, C_out, H, W)

    # ------- main path: lane axis = H*W, 2-D (N, HW-tiles) parallel grid -------
    lanes = _derive_max_tile_lanes(C_in, C_out, x_bytes, out_bytes, use_noise, budget)
    if max_tile_lanes is not None:
        lanes = min(lanes, max(128, (int(max_tile_lanes) // 128) * 128))
    hw_pad, hw_tile = _choose_hw_tiling(HW, lanes, want_multi_tiles=(N == 1))
    num_t = hw_pad // hw_tile

    x_mm = x_flat.astype(matmul_dtype)
    if hw_pad != HW:
        x_mm = jnp.pad(x_mm, ((0, 0), (0, 0), (0, hw_pad - HW)))       # lane-pad, sliced away
    bias_col = bias_scaled.reshape(C_out, 1)

    in_specs = [
        pl.BlockSpec((1, C_out, C_in), lambda n, t: (n, 0, 0)),        # lhs = w_ready (per-sample,
        pl.BlockSpec((1, C_in, hw_tile), lambda n, t: (n, 0, t)),      #   re-DMA only when n changes)
        pl.BlockSpec((C_out, 1), lambda n, t: (0, 0)),                 # bias (resident)
    ]
    args = [w_ready, x_mm, bias_col]
    if use_noise:
        if noise.ndim == 2:                                            # const (H, W) buffer
            nz = noise.reshape(1, 1, HW).astype(jnp.float32)
            nmap = lambda n, t: (0, 0, t)
        else:                                                          # per-sample map
            nz = noise.reshape(N, 1, HW).astype(jnp.float32)
            nmap = lambda n, t: (n, 0, t)
        if hw_pad != HW:
            nz = jnp.pad(nz, ((0, 0), (0, 0), (0, hw_pad - HW)))
        in_specs.append(pl.BlockSpec((1, 1, hw_tile), nmap))
        args.append(nz)

    out_flat = pl.pallas_call(
        kernel,
        out_shape=jax.ShapeDtypeStruct((N, C_out, hw_pad), out_dtype),
        grid_spec=pltpu.PrefetchScalarGridSpec(
            num_scalar_prefetch=0,
            grid=(N, num_t),
            in_specs=in_specs,
            out_specs=pl.BlockSpec((1, C_out, hw_tile), lambda n, t: (n, 0, t)),
        ),
        compiler_params=pltpu.CompilerParams(
            dimension_semantics=("parallel", "parallel"),
            vmem_limit_bytes=budget,
        ),
    )(*args)

    if hw_pad != HW:
        out_flat = out_flat[:, :, :HW]
    return out_flat.reshape(N, C_out, H, W)


def stylegan2_conv_reference(x, w, params, *, demodulate=True, noise=None,
                             noise_strength=0.0, gain=1.0, conv_clamp=None,
                             activation_gain=math.sqrt(2.0), negative_slope=0.2):
    """Pure-JAX f32 reference mirroring the PyTorch StyleGAN2Conv forward (k=1, factor=1)."""
    N, C_in, H, W = x.shape
    latent_dim = w.shape[1]
    conv_w = params["conv_weight"]
    C_out = conv_w.shape[0]

    styles = (w @ params["affine_weight"].T) * (1.0 / math.sqrt(latent_dim)) \
        + params["affine_bias"]
    w2d = conv_w.reshape(C_out, C_in)
    w_mod = w2d[None, :, :] * styles[:, None, :]
    if demodulate:
        d = jax.lax.rsqrt(jnp.sum(w_mod * w_mod, axis=-1) + 1e-8)
        w_mod = w_mod * d[:, :, None]
    out = jnp.einsum("noc,nchw->nohw", w_mod, x)
    if noise is not None:
        nz = noise * noise_strength
        nz = nz[None, None] if nz.ndim == 2 else nz.reshape(N, 1, H, W)
        out = out + nz
    out = out + params["bias"]
    out = out * (activation_gain * gain)
    out = jnp.where(out >= 0.0, out, negative_slope * out)
    if conv_clamp is not None:
        c = conv_clamp * gain
        out = jnp.clip(out, -c, c)
    return out


def _make_params(key, c_in, c_out, latent_dim):
    k_aff, k_conv = jax.random.split(key)
    return {
        # FullyConnected(latent_dim, in_channels, bias_init=1.0): weight ~ randn, bias = 1
        "affine_weight": jax.random.normal(k_aff, (c_in, latent_dim), jnp.float32),
        "affine_bias": jnp.full((c_in,), 1.0, jnp.float32),
        # UpsampleConv2d(in, out, k=1, bias=False, demodulate=True): weight ~ randn
        "conv_weight": jax.random.normal(k_conv, (c_out, c_in, 1, 1), jnp.float32),
        # self.bias = zeros([1, out_channels, 1, 1])
        "bias": jnp.zeros((1, c_out, 1, 1), jnp.float32),
    }


if __name__ == "__main__":
    key = jax.random.PRNGKey(0)
    k_p1, k_p2, k_x1, k_w1, k_n1, k_x2, k_w2, k_n2 = jax.random.split(key, 8)

    # ---------------- Test A/B: main path (N=2, C_in=8, C_out=16, 16x16) ----------------
    N, C_in, C_out, latent_dim, res = 2, 8, 16, 32, 16
    conv_clamp, noise_strength, gain = 256.0, 0.1, 1.0
    params = _make_params(k_p1, C_in, C_out, latent_dim)
    noise_const = jax.random.normal(k_n1, (res, res), jnp.float32)       # const-mode buffer
    x = jax.random.normal(k_x1, (N, C_in, res, res), jnp.float32)
    w_lat = jax.random.normal(k_w1, (N, latent_dim), jnp.float32)

    ref = jax.block_until_ready(stylegan2_conv_reference(
        x, w_lat, params, demodulate=True, noise=noise_const,
        noise_strength=noise_strength, gain=gain, conv_clamp=conv_clamp))

    # A) f32 matmul / f32 out: tight semantic check.
    out_f32 = jax.block_until_ready(stylegan2_conv_forward(
        x, w_lat, params, demodulate=True, noise=noise_const,
        noise_strength=noise_strength, gain=gain, conv_clamp=conv_clamp,
        matmul_dtype=jnp.float32, out_dtype=jnp.float32))
    np.testing.assert_allclose(np.asarray(out_f32), np.asarray(ref), rtol=1e-4, atol=1e-3)

    # B) default bf16 matmul + bf16 output: loose tolerance (bf16 rounding only).
    out_bf16 = jax.block_until_ready(stylegan2_conv_forward(
        x, w_lat, params, demodulate=True, noise=noise_const,
        noise_strength=noise_strength, gain=gain, conv_clamp=conv_clamp,
        out_dtype=jnp.bfloat16))
    np.testing.assert_allclose(np.asarray(out_bf16, dtype=np.float32), np.asarray(ref),
                               rtol=5e-2, atol=1e-1)

    # -------- Test C: small-spatial / channels-last path (C_out=128, 8x8, per-sample noise) --------
    N2, C_in2, C_out2, res2 = 2, 16, 128, 8
    params2 = _make_params(k_p2, C_in2, C_out2, latent_dim)
    noise_ps = jax.random.normal(k_n2, (N2, res2, res2), jnp.float32)    # per-sample noise map
    x2 = jax.random.normal(k_x2, (N2, C_in2, res2, res2), jnp.float32)
    w_lat2 = jax.random.normal(k_w2, (N2, latent_dim), jnp.float32)

    ref2 = jax.block_until_ready(stylegan2_conv_reference(
        x2, w_lat2, params2, demodulate=True, noise=noise_ps,
        noise_strength=noise_strength, gain=gain, conv_clamp=None))
    out2 = jax.block_until_ready(stylegan2_conv_forward(
        x2, w_lat2, params2, demodulate=True, noise=noise_ps,
        noise_strength=noise_strength, gain=gain, conv_clamp=None))
    np.testing.assert_allclose(np.asarray(out2, dtype=np.float32), np.asarray(ref2),
                               rtol=5e-2, atol=1.5e-1)

    print("KERNEL_OK")
</pallas_src>

<mosaic_0001>
module attributes {stable_mosaic.version = 11 : i64} {
  func.func @compute(%arg0: i32, %arg1: i32, %arg2: memref<1x16x8xf32, #tpu.memory_space<vmem>>, %arg3: memref<1x8x256xf32, #tpu.memory_space<vmem>>, %arg4: memref<16x1xf32, #tpu.memory_space<vmem>>, %arg5: memref<1x1x256xf32, #tpu.memory_space<vmem>>, %arg6: memref<1x16x256xf32, #tpu.memory_space<vmem>>) attributes {dimension_semantics = [#tpu.dimension_semantics<parallel>, #tpu.dimension_semantics<parallel>], iteration_bounds = array<i64: 2, 1>, scalar_prefetch = 0 : i64, scratch_operands = 0 : i64, tpu.core_type = #tpu.core_type<tc>, window_params = [{transform_indices = @transform_0, window_bounds = array<i64: 1, 16, 8>}, {transform_indices = @transform_1, window_bounds = array<i64: 1, 8, 256>}, {pipeline_mode = #tpu.pipeline_mode<synchronous>, transform_indices = @transform_2, window_bounds = array<i64: 16, 1>}, {transform_indices = @transform_3, window_bounds = array<i64: 1, 1, 256>}, {transform_indices = @transform_4, window_bounds = array<i64: 1, 16, 256>}]} {
    %c0 = arith.constant 0 : index
    %c0_0 = arith.constant 0 : index
    %c0_1 = arith.constant 0 : index
    %0 = vector.load %arg2[%c0, %c0_0, %c0_1] : memref<1x16x8xf32, #tpu.memory_space<vmem>>, vector<1x16x8xf32>
    %1 = vector.shape_cast %0 : vector<1x16x8xf32> to vector<16x8xf32>
    %c0_2 = arith.constant 0 : index
    %c0_3 = arith.constant 0 : index
    %c0_4 = arith.constant 0 : index
    %2 = vector.load %arg3[%c0_2, %c0_3, %c0_4] : memref<1x8x256xf32, #tpu.memory_space<vmem>>, vector<1x8x256xf32>
    %3 = vector.shape_cast %2 : vector<1x8x256xf32> to vector<8x256xf32>
    %cst = arith.constant dense<0.000000e+00> : vector<16x256xf32>
    %4 = tpu.matmul %1, %3, %cst {dimension_numbers = #tpu.dot_dimension_numbers<[1], [0], [0], [1], [0, 0, 1, 1], [], []>} : vector<16x8xf32>, vector<8x256xf32>, vector<16x256xf32> -> vector<16x256xf32>
    %c0_5 = arith.constant 0 : index
    %c0_6 = arith.constant 0 : index
    %c0_7 = arith.constant 0 : index
    %5 = vector.load %arg5[%c0_5, %c0_6, %c0_7] : memref<1x1x256xf32, #tpu.memory_space<vmem>>, vector<1x1x256xf32>
    %6 = vector.shape_cast %5 : vector<1x1x256xf32> to vector<1x256xf32>
    %cst_8 = arith.constant 0.141421363 : f32
    %7 = vector.broadcast %cst_8 : f32 to vector<1x256xf32>
    %8 = arith.mulf %6, %7 : vector<1x256xf32>
    %9 = vector.broadcast %8 : vector<1x256xf32> to vector<16x256xf32>
    %10 = arith.addf %4, %9 : vector<16x256xf32>
    %c0_9 = arith.constant 0 : index
    %c0_10 = arith.constant 0 : index
    %11 = vector.load %arg4[%c0_9, %c0_10] : memref<16x1xf32, #tpu.memory_space<vmem>>, vector<16x1xf32>
    %12 = vector.broadcast %11 : vector<16x1xf32> to vector<16x256xf32>
    %13 = arith.addf %10, %12 : vector<16x256xf32>
    %cst_11 = arith.constant 0.000000e+00 : f32
    %14 = vector.broadcast %cst_11 : f32 to vector<16x256xf32>
    %15 = arith.cmpf oge, %13, %14 : vector<16x256xf32>
    %cst_12 = arith.constant 2.000000e-01 : f32
    %16 = vector.broadcast %cst_12 : f32 to vector<16x256xf32>
    %17 = arith.mulf %16, %13 : vector<16x256xf32>
    %18 = arith.select %15, %13, %17 : vector<16x256xi1>, vector<16x256xf32>
    %cst_13 = arith.constant -2.560000e+02 : f32
    %cst_14 = arith.constant 2.560000e+02 : f32
    %19 = vector.broadcast %cst_13 : f32 to vector<16x256xf32>
    %20 = arith.maximumf %19, %18 : vector<16x256xf32>
    %21 = vector.broadcast %cst_14 : f32 to vector<16x256xf32>
    %22 = arith.minimumf %21, %20 : vector<16x256xf32>
    %c0_15 = arith.constant 0 : index
    %c0_16 = arith.constant 0 : index
    %c0_17 = arith.constant 0 : index
    %23 = vector.load %arg6[%c0_15, %c0_16, %c0_17] : memref<1x16x256xf32, #tpu.memory_space<vmem>>, vector<1x16x256xf32>
    %24 = vector.shape_cast %23 : vector<1x16x256xf32> to vector<16x256xf32>
    %25 = vector.shape_cast %22 : vector<16x256xf32> to vector<1x16x256xf32>
    tpu.vector_store %arg6[%c0_15, %c0_16, %c0_17], %25 {strides = array<i32>} : memref<1x16x256xf32, #tpu.memory_space<vmem>>, vector<1x16x256xf32>,
    return
  }
  func.func @transform_0(%arg0: i32, %arg1: i32) -> (i32, i32, i32) {
    %c0_i32 = arith.constant 0 : i32
    %c0_i32_0 = arith.constant 0 : i32
    %c0_i32_1 = arith.constant 0 : i32
    return %arg0, %c0_i32, %c0_i32_0 : i32, i32, i32
  }
  func.func @transform_1(%arg0: i32, %arg1: i32) -> (i32, i32, i32) {
    %c0_i32 = arith.constant 0 : i32
    %c0_i32_0 = arith.constant 0 : i32
    return %arg0, %c0_i32, %arg1 : i32, i32, i32
  }
  func.func @transform_2(%arg0: i32, %arg1: i32) -> (i32, i32) {
    %c0_i32 = arith.constant 0 : i32
    %c0_i32_0 = arith.constant 0 : i32
    %c0_i32_1 = arith.constant 0 : i32
    return %c0_i32, %c0_i32_0 : i32, i32
  }
  func.func @transform_3(%arg0: i32, %arg1: i32) -> (i32, i32, i32) {
    %c0_i32 = arith.constant 0 : i32
    %c0_i32_0 = arith.constant 0 : i32
    %c0_i32_1 = arith.constant 0 : i32
    return %c0_i32, %c0_i32_0, %arg1 : i32, i32, i32
  }
  func.func @transform_4(%arg0: i32, %arg1: i32) -> (i32, i32, i32) {
    %c0_i32 = arith.constant 0 : i32
    %c0_i32_0 = arith.constant 0 : i32
    return %arg0, %c0_i32, %arg1 : i32, i32, i32
  }
}

</mosaic_0001>

<bundles_post_ra>
// kernel: tpu_custom_call.1
= control target key start
LH: loop header
LB: loop body
LE: loop exit
PB: predicated region body
PF: predicated region fallthrough
CT: control target
= control target key end

     0   :  { %9 = vsyncpa [#allocation3], 0  ;;  %s800_s0 = inlined_call_operand.vmem [shape: f32[2,16,8], index: 0, kind: input, shape index: {}]   ;;  %s801_s1 = inlined_call_operand.vmem [shape: f32[2,8,256], index: 1, kind: input, shape index: {}]   ;;  %s802_s2 = inlined_call_operand.vmem [shape: f32[16,1], index: 2, kind: input, shape index: {}]   ;;  %s803_s3 = inlined_call_operand.vmem [shape: f32[1,1,256], index: 3, kind: input, shape index: {}]   ;;  %s804_s4 = inlined_call_operand.hbm [shape: f32[2,16,256], index: 4, kind: output, shape index: {}]  }
   0x1   :  { %11 = vsyncpa [#allocation3 + $0x1], 0  ;;  %s687_s15 = smov 0   ;;  %s689_s16 = smov 0  }
   0x2   :  { %s691_s17 = smov 0   ;;  %s693_s18 = smov 0  }
   0x3   :  { %s695_s19 = smov 0   ;;  %s697_s20 = smov 0  }
   0x4 LB: > { %s491_s21 = sadd.s32 4294967295, %s657_s20   ;;  %s492_s22 = sadd.s32 4294967294, %s657_s20   ;;  %s657_s20 = sphi %s697_s20, %s17_s20   ;;  %s653_s19 = sphi %s695_s19, %s811_s19   ;;  %s649_s18 = sphi %s693_s18, %s810_s18   ;;  %s645_s17 = sphi %s691_s17, %s809_s17   ;;  %s641_s16 = sphi %s689_s16, %s808_s16   ;;  %s637_s15 = sphi %s687_s15, %s807_s15  }
   0x5   : > { %s29_s23 = sadd.s32 1, %s653_s19  ;;  %s139_s24 = sadd.s32 1, %s645_s17 }
   0x6   : > { %p31_p0 = scmp.ge.s32.totalorder %s29_s23, 2  ;;  %p149_p1 = scmp.ne.s32.totalorder %s645_s17, %s641_s16 }
   0x7   : > { %p150_p2 = scmp.eq.s32.totalorder %s491_s21, 1  ;;  %p155_p3 = scmp.ne.s32.totalorder %s641_s16, %s637_s15 }
   0x8   : > { %s813_s23 = smov (%p31_p0, %s29_s23), 0  ;;  %p156_p5 = scmp.eq.s32.totalorder %s492_s22, 1 }
   0x9   : > { %p727_p4 = por %p150_p2, %p149_p1  ;;  %s134_s26 = ssub.s32 %s653_s19, %s813_s23 }
   0xa   : > { %p496_p6 = scmp.ge.s32.totalorder %s657_s20, 1  ;;  %p137_p7 = scmp.eq.s32.totalorder %s134_s26, 0 }
   0xb   : > { %p734_p8 = por %p156_p5, %p155_p3  ;;  %p206_p9 = scmp.lt.s32.totalorder %s657_s20, 3 }
   0xc   : > { %s740_s28 = scalar_select %p137_p7, %s645_s17, %s139_s24  }
   0xd   : > { %p207_p10 = pnand %p496_p6, %p206_p9 }
   0xe   : > { %p245_p11 = scmp.lt.s32.totalorder (!%p207_p10), %s649_s18, 1  ;;  %s242_s24 = sand.u32 (!%p207_p10), 1, %s641_s16  }
   0xf   : > { %210 = sbr.rel (%p207_p10) target bundleno = 173 (0xad), region = 36  ;;  %s497_s26 = sshll.u32 (!%p207_p10), %s242_s24, 5 }
  0x10   : > { %s517_s29 = sshll.u32 (!%p207_p10), %s649_s18, 5  ;;  %s244_s7 = scalar_lea.vmem (!%p207_p10), [#allocation2], %s497_s26 }
  0x11   : > { %s599_s14 = scalar_lea.hbm (!%p207_p10), %s804_s4, 64 }
  0x14   : > { %v330_v0 = vld [vmem:[%s802_s2] sm:$0xff]  ;;  %v659_v1 = vmov 0   ;;  %s246_s5 = scalar_select %p245_p11, %s649_s18, 1  ;;  %vm277_vm0 = vcmask 64512   ;;  %v331_v6 = vld [vmem:[%s802_s2 + $0x8] sm:$0xff] }
  0x15   : > { %578 = vset.pattern.permute.xlu0 %v659_v1  ;;  %v270_v7 = vld [vmem:[%s803_s3] sm:$0x3]  ;;  %s385_s18 = sshll.u32 %s244_s7, 4  ;;  %s386_s18 = int_to_ptr.vmem [resolvable:$true] %s385_s18 }
  0x16   : > { %334 = vperm.xlu0 %578, %v330_v0   ;;  %s515_s6 = sshll.u32 %s246_s5, 4  ;;  %v271_v8 = vmul.f32 0.14142136, %v270_v7 }
  0x17   : > { %s258_s9 = scalar_lea.vmem %s801_s1, %s515_s6  ;;  %s249_s12 = scalar_lea.vmem %s800_s0, %s515_s6 }
  0x18   : > { %v268_v2 = vld [vmem:[%s258_s9] sm:$0xff]  ;;  %v269_v3 = vld [vmem:[%s258_s9 + $0x8] sm:$0xff]  ;;  %v273_v9 = vperm.slane %v271_v8, 0  ;;  %v274_v11 = vperm.slane %v271_v8, 1  ;;  %s384_s6 = scalar_lea.hbm %s804_s4, %s517_s29  ;;  %s371_s9 = scalar_lea.sflag [#allocation3], %s242_s24 }
  0x19   : > { %v266_v4 = vld [vmem:[%s249_s12] sm:$0xff]  ;;  %299 = vmatpush.msra.mxu0 %v268_v2  ;;  %518 = vmatpush.msra.mxu2 %v268_v2  ;;  %v267_v5 = vld [vmem:[%s249_s12 + $0x8] sm:$0xff]  ;;  %s387_s8 = sshll.u32 %s384_s6, 4  ;;  %s388_s8 = int_to_ptr.hbm [resolvable:$true] %s387_s8 }
  0x1a   : > { %322 = vmatpush.msra.mxu1 %v269_v3  ;;  %519 = vmatpush.msra.mxu3 %v269_v3  ;;  %s593_s10 = sshra.s32 %s388_s8, 4  ;;  %s594_s10 = int_to_ptr.hbm [resolvable:$true] %s593_s10 }
  0x1b   : > { %502 = vmatmul.msk.f32.vlgmr.msra.gmra.mxu0 %vm277_vm0, %v266_v4  ;;  %503 = vmatmul.msk.f32.vlgmr.msra.gmra.mxu2 %vm277_vm0, %v267_v5  ;;  %s595_s11 = scalar_lea.hbm %s594_s10, 32  ;;  %p600_p1 = scmp.lt.s32.totalorder %s594_s10, %s804_s4 }
  0x1c   : > { %504 = vmatmul.msk.f32.vlgmr.msra.gmra.mxu1 %vm277_vm0, %v266_v4  ;;  %505 = vmatmul.msk.f32.vlgmr.msra.gmra.mxu3 %vm277_vm0, %v267_v5  ;;  %p596_p12 = scmp.ne.s32.totalorder %s594_s10, %s595_s11  ;;  %p601_p2 = scmp.lt.s32.totalorder %s599_s14, %s595_s11 }
  0x1e   : > { %339 = vperm.xlu0 %578, %v331_v6   ;;  %p597_p13 = pnand %p596_p12, %p727_p4  ;;  %p602_p3 = por %p601_p2, %p600_p1 }
  0x20   : > { %p598_p0 = pneg %p597_p13 }
  0x22   : > { %p603_p5 = pnand %p602_p3, %p598_p0 }
  0x88   : > { %v335_v10 = vpop.permute.xlu0 %334 }
  0x90   : > { %v340_v24 = vpop.permute.xlu0 %339 }
  0x98   : > { %v301_v12 = vpop.f32.mrf.mxu0 }
  0x99   : > { %v302_v13 = vadd.f32 %v301_v12, %v273_v9  ;;  %v324_v14 = vpop.f32.mrf.mxu1 }
  0x9a   : > { %v325_v15 = vadd.f32 %v324_v14, %v274_v11 }
  0x9b   : > { %v342_v16 = vadd.f32 %v335_v10, %v302_v13 }
  0x9c   : > { %v343_v17 = vadd.f32 %v335_v10, %v325_v15 }
  0x9d   : > { %vm346_vm1 = vcmp.ge.f32.partialorder %v342_v16, 0.0  ;;  %v350_v18 = vmul.f32 0.2, %v342_v16 }
  0x9e   : > { %vm347_vm2 = vcmp.ge.f32.partialorder %v343_v17, 0.0  ;;  %v351_v19 = vmul.f32 0.2, %v343_v17  ;;  %v304_v20 = vpop.f32.mrf.mxu2 }
  0x9f   : > { %v354_v21 = vsel %vm346_vm1, %v342_v16, %v350_v18  ;;  %v305_v22 = vadd.f32 %v304_v20, %v273_v9  ;;  %v327_v23 = vpop.f32.mrf.mxu3 }
  0xa0   : > { %v506_v25 = vclamps-f32 %v354_v21, 256.0  ;;  %v355_v26 = vsel %vm347_vm2, %v343_v17, %v351_v19  ;;  %v328_v27 = vadd.f32 %v327_v23, %v274_v11 }
  0xa1   : > { %v507_v28 = vclamps-f32 %v355_v26, 256.0  ;;  %v344_v29 = vadd.f32 %v340_v24, %v305_v22 }
  0xa2   : > { %366 = vst [vmem:[%s244_s7] sm:$0xff] %v506_v25  ;;  %v345_v30 = vadd.f32 %v340_v24, %v328_v27 }
  0xa3   : > { %367 = vst [vmem:[%s244_s7 + $0x8] sm:$0xff] %v507_v28  ;;  %vm348_vm3 = vcmp.ge.f32.partialorder %v344_v29, 0.0  ;;  %v352_v31 = vmul.f32 0.2, %v344_v29 }
  0xa4   : > { %vm349_vm4 = vcmp.ge.f32.partialorder %v345_v30, 0.0  ;;  %v353_v32 = vmul.f32 0.2, %v345_v30 }
  0xa5   : > { %v356_v33 = vsel %vm348_vm3, %v344_v29, %v352_v31 }
  0xa6   : > { %v508_v34 = vclamps-f32 %v356_v33, 256.0  ;;  %v357_v35 = vsel %vm349_vm4, %v345_v30, %v353_v32 }
  0xa7   : > { %v509_v36 = vclamps-f32 %v357_v35, 256.0 }
  0xa8   : > { %368 = vst [vmem:[%s244_s7 + $0x10] sm:$0xff] %v508_v34 }
  0xa9   : > { %369 = vst [vmem:[%s244_s7 + $0x18] sm:$0xff] %v509_v36 }
  0xaa   : > { %606 = shalt.err (!%p603_p5)
}
  0xab   : > { %s660_s24 = smov 256   ;;  %s661_s26 = smov 16  }
  0xac   : > { %520 = dma.vmem_to_hbm [thread:$0]  (%p727_p4), %s386_s18, 512, %s388_s8, %s371_s9, %s660_s24, %s660_s24, %s661_s26  }
  0xad PF: > { %p526_p6 = scmp.ge.s32.totalorder %s657_s20, 2  ;;  %s402_s29 = sand.u32 1, %s637_s15  }
  0xae   : > { %s403_s30 = scalar_lea.sflag [#allocation3], %s402_s29 }
  0xaf   : > { %p523_p7 = pnand %p526_p6, %p734_p8 }
  0xb1   : > { %p524_p9 = pneg %p523_p7 }
  0xb3   : > { %632 = dma.done.wait (%p524_p9), %s403_s30, 512  }
  0xb4   : > { %634 = vsyncadd (%p524_p9), %s403_s30, 4294966784  ;;  %s17_s20 = sadd.s32 1, %s657_s20   ;;  %s807_s15 = smov %s641_s16 }
  0xb5   : > { %p14_p10 = scmp.ge.s32.totalorder %s17_s20, 4   ;;  %s808_s16 = smov %s645_s17 }
  0xb6   : > { %s809_s17 = smov %s740_s28  ;;  %s810_s18 = smov %s653_s19 }
  0xb7   : > { %s811_s19 = smov %s813_s23  ;;  %16 = sbr.rel (!%p14_p10) target bundleno = 4 (0x4), region = 77 }
  0xbc   :  { %409 = vsyncpa [#allocation3], 1 }
  0xbd   :  { %411 = vsyncpa [#allocation3 + $0x1], 1 }

</bundles_post_ra>
